<compile_context>
chip_gen: v6e
topology: v6e:2x2x1
jax: 0.10.0
libtpu: 0.0.40
codegen_flags: <defaults>
</compile_context>

<pallas_src>
import math
from functools import partial

import jax
import jax.numpy as jnp
from jax.experimental import pallas as pl
from jax.experimental.pallas import tpu as pltpu

NHEAD = 8
LN_EPS = 1e-5
NEG_INF = -1e9  # finite stand-in for -inf masking (avoids NaN rows)


def _vmem_limit_bytes():
    try:
        cap = int(pltpu.get_tpu_info().vmem_capacity_bytes)
    except Exception:
        cap = 64 * 1024 * 1024
    return int(max(32 << 20, min((cap * 3) // 4, 96 << 20)))


_VMEM_LIMIT_BYTES = _vmem_limit_bytes()


def _pick_tile(dim, candidates):
    """Largest candidate tile that evenly divides `dim`, else the full dim."""
    for c in candidates:
        if dim >= c and dim % c == 0:
            return c
    return dim


_M_TILES = (512, 256, 128, 64, 32, 16, 8)
_M_TILES_LN = (256, 128, 64, 32, 16, 8)   # N kept whole in linear_add_ln -> cap tm
_N_TILES = (512, 256, 128)
_K_TILES = (512, 256, 128)
_S_TILES = (256, 128, 64, 32, 16, 8)


# --------------------------------------------------------------------------
# Linear (+ optional ReLU), tiled with f32 accumulation
# --------------------------------------------------------------------------

def _matmul_kernel_1k(x_ref, w_ref, b_ref, o_ref, *, activation):
    """Single-K fast path: y = x @ w + b, no scratch accumulator."""
    y = jnp.dot(x_ref[...].astype(jnp.bfloat16), w_ref[...],
                preferred_element_type=jnp.float32) + b_ref[...]
    if activation == "relu":
        y = jnp.maximum(y, 0.0)
    o_ref[...] = y.astype(o_ref.dtype)


def _matmul_kernel(x_ref, w_ref, b_ref, o_ref, acc_ref, *, activation):
    """General path: K-tiled accumulation into f32 VMEM scratch."""
    @pl.when(pl.program_id(2) == 0)
    def _():
        acc_ref[...] = jnp.zeros(acc_ref.shape, jnp.float32)

    acc_ref[...] += jnp.dot(x_ref[...].astype(jnp.bfloat16), w_ref[...],
                            preferred_element_type=jnp.float32)

    @pl.when(pl.program_id(2) == pl.num_programs(2) - 1)
    def _():
        y = acc_ref[...] + b_ref[...]
        if activation == "relu":
            y = jnp.maximum(y, 0.0)
        o_ref[...] = y.astype(o_ref.dtype)


def linear(x2d, w, b, activation=None, out_dtype=jnp.bfloat16):
    """x2d: (M, K) bf16/f32, w: (K, N) bf16, b: (N,) f32  ->  (M, N) out_dtype."""
    M, K = x2d.shape
    K2, N = w.shape
    assert K == K2
    tm = _pick_tile(M, _M_TILES)
    tn = _pick_tile(N, _N_TILES)
    tk = _pick_tile(K, _K_TILES)
    b2d = b.reshape(1, N)

    if K == tk:  # single reduction step: skip accumulator / phases entirely
        return pl.pallas_call(
            partial(_matmul_kernel_1k, activation=activation),
            out_shape=jax.ShapeDtypeStruct((M, N), out_dtype),
            grid=(M // tm, N // tn),
            in_specs=[
                pl.BlockSpec((tm, K), lambda i, j: (i, 0)),
                pl.BlockSpec((K, tn), lambda i, j: (0, j)),
                pl.BlockSpec((1, tn), lambda i, j: (0, j)),
            ],
            out_specs=pl.BlockSpec((tm, tn), lambda i, j: (i, j)),
            compiler_params=pltpu.CompilerParams(
                dimension_semantics=("parallel", "parallel"),
                vmem_limit_bytes=_VMEM_LIMIT_BYTES),
        )(x2d, w, b2d)

    return pl.pallas_call(
        partial(_matmul_kernel, activation=activation),
        out_shape=jax.ShapeDtypeStruct((M, N), out_dtype),
        grid=(M // tm, N // tn, K // tk),
        in_specs=[
            pl.BlockSpec((tm, tk), lambda i, j, k: (i, k)),
            pl.BlockSpec((tk, tn), lambda i, j, k: (k, j)),
            pl.BlockSpec((1, tn), lambda i, j, k: (0, j)),
        ],
        out_specs=pl.BlockSpec((tm, tn), lambda i, j, k: (i, j)),
        scratch_shapes=[pltpu.VMEM((tm, tn), jnp.float32)],
        compiler_params=pltpu.CompilerParams(
            dimension_semantics=("parallel", "parallel", "arbitrary"),
            vmem_limit_bytes=_VMEM_LIMIT_BYTES),
    )(x2d, w, b2d)


# --------------------------------------------------------------------------
# Linear + residual add + LayerNorm fused epilogue
# --------------------------------------------------------------------------

def _addln_epilogue(y, r_ref, g_ref, bb_ref, o_ref):
    y = y + r_ref[...].astype(jnp.float32)
    mu = jnp.mean(y, axis=-1, keepdims=True)
    var = jnp.mean((y - mu) ** 2, axis=-1, keepdims=True)
    yn = (y - mu) * jax.lax.rsqrt(var + LN_EPS)
    o_ref[...] = (yn * g_ref[...] + bb_ref[...]).astype(o_ref.dtype)


def _matmul_addln_kernel_1k(x_ref, w_ref, b_ref, r_ref, g_ref, bb_ref, o_ref):
    y = jnp.dot(x_ref[...].astype(jnp.bfloat16), w_ref[...],
                preferred_element_type=jnp.float32) + b_ref[...]
    _addln_epilogue(y, r_ref, g_ref, bb_ref, o_ref)


def _matmul_addln_kernel(x_ref, w_ref, b_ref, r_ref, g_ref, bb_ref, o_ref, acc_ref):
    @pl.when(pl.program_id(1) == 0)
    def _():
        acc_ref[...] = jnp.zeros(acc_ref.shape, jnp.float32)

    acc_ref[...] += jnp.dot(x_ref[...].astype(jnp.bfloat16), w_ref[...],
                            preferred_element_type=jnp.float32)

    @pl.when(pl.program_id(1) == pl.num_programs(1) - 1)
    def _():
        _addln_epilogue(acc_ref[...] + b_ref[...], r_ref, g_ref, bb_ref, o_ref)


def linear_add_ln(x2d, w, b, res2d, gamma, beta, out_dtype=jnp.bfloat16):
    """(M,K)@(K,N) + b, then residual add + LayerNorm over N, all in one call."""
    M, K = x2d.shape
    K2, N = w.shape
    assert K == K2 and res2d.shape == (M, N)
    tm = _pick_tile(M, _M_TILES_LN)
    tk = _pick_tile(K, _K_TILES)
    b2d, g2d, bb2d = b.reshape(1, N), gamma.reshape(1, N), beta.reshape(1, N)

    if K == tk:  # single reduction step fast path
        return pl.pallas_call(
            _matmul_addln_kernel_1k,
            out_shape=jax.ShapeDtypeStruct((M, N), out_dtype),
            grid=(M // tm,),
            in_specs=[
                pl.BlockSpec((tm, K), lambda i: (i, 0)),
                pl.BlockSpec((K, N), lambda i: (0, 0)),
                pl.BlockSpec((1, N), lambda i: (0, 0)),
                pl.BlockSpec((tm, N), lambda i: (i, 0)),
                pl.BlockSpec((1, N), lambda i: (0, 0)),
                pl.BlockSpec((1, N), lambda i: (0, 0)),
            ],
            out_specs=pl.BlockSpec((tm, N), lambda i: (i, 0)),
            compiler_params=pltpu.CompilerParams(
                dimension_semantics=("parallel",),
                vmem_limit_bytes=_VMEM_LIMIT_BYTES),
        )(x2d, w, b2d, res2d, g2d, bb2d)

    return pl.pallas_call(
        _matmul_addln_kernel,
        out_shape=jax.ShapeDtypeStruct((M, N), out_dtype),
        grid=(M // tm, K // tk),  # N kept whole: LN reduces over the full feature dim
        in_specs=[
            pl.BlockSpec((tm, tk), lambda i, k: (i, k)),
            pl.BlockSpec((tk, N), lambda i, k: (k, 0)),
            pl.BlockSpec((1, N), lambda i, k: (0, 0)),
            pl.BlockSpec((tm, N), lambda i, k: (i, 0)),
            pl.BlockSpec((1, N), lambda i, k: (0, 0)),
            pl.BlockSpec((1, N), lambda i, k: (0, 0)),
        ],
        out_specs=pl.BlockSpec((tm, N), lambda i, k: (i, 0)),
        scratch_shapes=[pltpu.VMEM((tm, N), jnp.float32)],
        compiler_params=pltpu.CompilerParams(
            dimension_semantics=("parallel", "arbitrary"),
            vmem_limit_bytes=_VMEM_LIMIT_BYTES),
    )(x2d, w, b2d, res2d, g2d, bb2d)


# --------------------------------------------------------------------------
# Flash attention: grid (B, Sq/tq, Sk/tk), all heads per grid step
# --------------------------------------------------------------------------

def _flash_attn_kernel(*refs, num_heads, head_dim, has_attn_mask, has_kpm):
    q_ref, k_ref, v_ref = refs[0], refs[1], refs[2]
    idx = 3
    am_ref = None
    if has_attn_mask:
        am_ref = refs[idx]; idx += 1
    kp_ref = None
    if has_kpm:
        kp_ref = refs[idx]; idx += 1
    o_ref, m_sc, l_sc, acc_sc = refs[idx], refs[idx + 1], refs[idx + 2], refs[idx + 3]

    ki = pl.program_id(2)

    @pl.when(ki == 0)
    def _():
        m_sc[...] = jnp.full(m_sc.shape, -jnp.inf, jnp.float32)
        l_sc[...] = jnp.zeros(l_sc.shape, jnp.float32)
        acc_sc[...] = jnp.zeros(acc_sc.shape, jnp.float32)

    q = q_ref[0]            # (tq, E) bf16; 1/sqrt(Dh) already folded into weights
    k = k_ref[0]            # (tk, E) bf16
    v = v_ref[0]            # (tk, E) bf16

    bias = None             # additive bias shared across heads
    if has_attn_mask:
        bias = am_ref[...]                          # (tq, tk) f32
    if has_kpm:
        kp = kp_ref[0]                              # (1, tk)  f32
        bias = kp if bias is None else bias + kp

    m_prev = m_sc[...]      # (tq, H)
    l_prev = l_sc[...]      # (tq, H)
    acc_prev = acc_sc[...]  # (tq, E)

    m_cols, l_cols, acc_cols = [], [], []
    for h in range(num_heads):                      # unrolled at trace time
        sl = slice(h * head_dim, (h + 1) * head_dim)
        s = jax.lax.dot_general(q[:, sl], k[:, sl], (((1,), (1,)), ((), ())),
                                preferred_element_type=jnp.float32)   # (tq, tk)
        if bias is not None:
            s = s + bias
        m_p = m_prev[:, h:h + 1]
        m_n = jnp.maximum(m_p, jnp.max(s, axis=-1, keepdims=True))
        alpha = jnp.exp(m_p - m_n)
        p = jnp.exp(s - m_n)
        l_n = alpha * l_prev[:, h:h + 1] + jnp.sum(p, axis=-1, keepdims=True)
        pv = jnp.dot(p.astype(jnp.bfloat16), v[:, sl],
                     preferred_element_type=jnp.float32)              # (tq, Dh)
        m_cols.append(m_n)
        l_cols.append(l_n)
        acc_cols.append(alpha * acc_prev[:, sl] + pv)

    m_sc[...] = jnp.concatenate(m_cols, axis=1)
    l_sc[...] = jnp.concatenate(l_cols, axis=1)
    acc_sc[...] = jnp.concatenate(acc_cols, axis=1)

    @pl.when(ki == pl.num_programs(2) - 1)
    def _():
        inv = pl.reciprocal(l_sc[...], approx=True)          # (tq, H)
        acc = acc_sc[...]                                    # (tq, E)
        o_cols = [acc[:, h * head_dim:(h + 1) * head_dim] * inv[:, h:h + 1]
                  for h in range(num_heads)]
        o_ref[0] = jnp.concatenate(o_cols, axis=1).astype(o_ref.dtype)  # dense (tq,E)


def flash_attention(q_arr, q_col, kv_arr, k_col, v_col, emb, Sq, Sk,
                    attn_mask, kpm_add, num_heads):
    """q_arr: (B, Sq, n*E) bf16; kv_arr: (B, Sk, m*E) bf16.  Q/K/V are selected by
    last-dim block index (q_col/k_col/v_col) so fused QKV needs no XLA slicing.
    attn_mask: (Sq, Sk) additive f32 or None; kpm_add: (B, 1, Sk) additive f32 or None."""
    B = q_arr.shape[0]
    E = emb
    head_dim = E // num_heads
    tq = _pick_tile(Sq, _S_TILES)
    tk = _pick_tile(Sk, _S_TILES)
    has_attn_mask = attn_mask is not None
    has_kpm = kpm_add is not None

    in_specs = [
        pl.BlockSpec((1, tq, E), lambda b, qi, ki, c=q_col: (b, qi, c)),
        pl.BlockSpec((1, tk, E), lambda b, qi, ki, c=k_col: (b, ki, c)),
        pl.BlockSpec((1, tk, E), lambda b, qi, ki, c=v_col: (b, ki, c)),
    ]
    inputs = [q_arr, kv_arr, kv_arr]
    if has_attn_mask:
        in_specs.append(pl.BlockSpec((tq, tk), lambda b, qi, ki: (qi, ki)))
        inputs.append(attn_mask.astype(jnp.float32))
    if has_kpm:
        in_specs.append(pl.BlockSpec((1, 1, tk), lambda b, qi, ki: (b, 0, ki)))
        inputs.append(kpm_add)

    # TODO(synk): when the caller's attn_mask is known-causal, generate it in-kernel
    # (broadcasted_iota) and skip fully-masked kv tiles; kept general here because the
    # module receives arbitrary mask tensors.
    return pl.pallas_call(
        partial(_flash_attn_kernel, num_heads=num_heads, head_dim=head_dim,
                has_attn_mask=has_attn_mask, has_kpm=has_kpm),
        out_shape=jax.ShapeDtypeStruct((B, Sq, E), jnp.bfloat16),
        grid=(B, Sq // tq, Sk // tk),
        in_specs=in_specs,
        out_specs=pl.BlockSpec((1, tq, E), lambda b, qi, ki: (b, qi, 0)),
        scratch_shapes=[
            pltpu.VMEM((tq, num_heads), jnp.float32),   # running max per head
            pltpu.VMEM((tq, num_heads), jnp.float32),   # running denom per head
            pltpu.VMEM((tq, E), jnp.float32),           # running accumulator
        ],
        compiler_params=pltpu.CompilerParams(
            dimension_semantics=("parallel", "parallel", "arbitrary"),
            vmem_limit_bytes=_VMEM_LIMIT_BYTES),
    )(*inputs)


# --------------------------------------------------------------------------
# Embedding scale + positional encoding (batch-first, lane/sublane dense)
# --------------------------------------------------------------------------

def _embed_pe_kernel(tok_ref, pe_ref, o_ref, *, scale):
    o_ref[...] = (tok_ref[...] * scale + pe_ref[...]).astype(o_ref.dtype)


def embed_posenc(tok_emb, pos_embedding):
    """tok_emb: (B, S, E) f32; pos_embedding: (1, maxlen, E) f32 -> (B, S, E) bf16."""
    B, S, E = tok_emb.shape
    pe = pos_embedding[:, :S]
    ts = _pick_tile(S, _S_TILES)
    return pl.pallas_call(
        partial(_embed_pe_kernel, scale=math.sqrt(E)),
        out_shape=jax.ShapeDtypeStruct((B, S, E), jnp.bfloat16),
        grid=(B, S // ts),
        in_specs=[
            pl.BlockSpec((1, ts, E), lambda b, i: (b, i, 0)),
            pl.BlockSpec((1, ts, E), lambda b, i: (0, i, 0)),
        ],
        out_specs=pl.BlockSpec((1, ts, E), lambda b, i: (b, i, 0)),
        compiler_params=pltpu.CompilerParams(
            dimension_semantics=("parallel", "parallel"),
            vmem_limit_bytes=_VMEM_LIMIT_BYTES),
    )(tok_emb, pe)


# --------------------------------------------------------------------------
# Transformer sublayers (thin glue; internal layout is batch-first (B, S, E))
# --------------------------------------------------------------------------

def self_attn_sublayer(x, p, attn_mask, kpm_add):
    """LayerNorm(x + SelfAttention(x)): fused QKV, head loop in-kernel, fused o-proj+LN."""
    B, S, E = x.shape
    qkv = linear(x.reshape(-1, E), p["w_qkv"], p["b_qkv"])          # (B*S, 3E) bf16
    qkv = qkv.reshape(B, S, 3 * E)
    attn = flash_attention(qkv, 0, qkv, 1, 2, E, S, S, attn_mask, kpm_add, NHEAD)
    y = linear_add_ln(attn.reshape(-1, E), p["w_o"], p["b_o"],
                      x.reshape(-1, E), p["ln_g"], p["ln_b"])
    return y.reshape(B, S, E)


def cross_attn_sublayer(x, memory, p, attn_mask, kpm_add):
    """LayerNorm(x + CrossAttention(x, memory)): fused KV, fused o-proj+LN."""
    B, Sq, E = x.shape
    Sk = memory.shape[1]
    q = linear(x.reshape(-1, E), p["w_q"], p["b_q"]).reshape(B, Sq, E)
    kv = linear(memory.reshape(-1, E), p["w_kv"], p["b_kv"]).reshape(B, Sk, 2 * E)
    attn = flash_attention(q, 0, kv, 0, 1, E, Sq, Sk, attn_mask, kpm_add, NHEAD)
    y = linear_add_ln(attn.reshape(-1, E), p["w_o"], p["b_o"],
                      x.reshape(-1, E), p["ln_g"], p["ln_b"])
    return y.reshape(B, Sq, E)


def ffn_sublayer(x, p):
    """LayerNorm(x + W2 ReLU(W1 x)) with W2+residual+LN fused."""
    B, S, E = x.shape
    h = linear(x.reshape(-1, E), p["w1"], p["b1"], activation="relu")
    y = linear_add_ln(h, p["w2"], p["b2"], x.reshape(-1, E), p["ln_g"], p["ln_b"])
    return y.reshape(B, S, E)


def encoder_layer(x, p, src_mask, src_kpm_add):
    x = self_attn_sublayer(x, p["self_attn"], src_mask, src_kpm_add)
    x = ffn_sublayer(x, p["ffn"])
    return x


def decoder_layer(x, memory, p, tgt_mask, memory_mask, tgt_kpm_add, mem_kpm_add):
    x = self_attn_sublayer(x, p["self_attn"], tgt_mask, tgt_kpm_add)
    x = cross_attn_sublayer(x, memory, p["cross_attn"], memory_mask, mem_kpm_add)
    x = ffn_sublayer(x, p["ffn"])
    return x


def _kpm_to_additive(kpm):
    """(B, S) bool key-padding mask -> (B, 1, S) additive f32 (shared across heads)."""
    if kpm is None:
        return None
    return jnp.where(kpm, NEG_INF, 0.0).astype(jnp.float32)[:, None, :]


def seq2seq_forward(params, src, trg, src_mask, tgt_mask,
                    src_padding_mask, tgt_padding_mask, memory_key_padding_mask):
    """src/trg: (S, B) int tokens (PyTorch layout); returns (S_tgt, B, tgt_vocab) f32."""
    E = params["emb_size"]
    pe = params["pos_embedding"]

    # Gather in batch-first layout directly: (B, S, E)
    src_emb = embed_posenc(jnp.take(params["src_emb"], src.T, axis=0), pe)
    tgt_emb = embed_posenc(jnp.take(params["tgt_emb"], trg.T, axis=0), pe)

    src_kpm_add = _kpm_to_additive(src_padding_mask)
    tgt_kpm_add = _kpm_to_additive(tgt_padding_mask)
    mem_kpm_add = _kpm_to_additive(memory_key_padding_mask)

    memory = src_emb
    for lp in params["enc_layers"]:
        memory = encoder_layer(memory, lp, src_mask, src_kpm_add)

    x = tgt_emb
    for lp in params["dec_layers"]:
        x = decoder_layer(x, memory, lp, tgt_mask, None, tgt_kpm_add, mem_kpm_add)

    B, S, _ = x.shape
    logits = linear(x.reshape(-1, E), params["gen_w"], params["gen_b"],
                    out_dtype=jnp.float32)
    return logits.reshape(B, S, -1).transpose(1, 0, 2)      # back to (S, B, vocab)


# --------------------------------------------------------------------------
# Deterministic parameter initialization (weights stored bf16 for the MXU path)
# --------------------------------------------------------------------------

def make_pos_embedding(emb_size, maxlen=64):
    den = jnp.exp(-jnp.arange(0, emb_size, 2, dtype=jnp.float32)
                  * math.log(10000.0) / emb_size)
    pos = jnp.arange(0, maxlen, dtype=jnp.float32)[:, None]
    s = jnp.sin(pos * den)
    c = jnp.cos(pos * den)
    pe = jnp.stack([s, c], axis=-1).reshape(maxlen, emb_size)
    return pe[None, :, :]                                      # (1, maxlen, E)


def init_linear_params(key, fan_in, fan_out):
    w = jax.random.normal(key, (fan_in, fan_out), jnp.float32) / math.sqrt(fan_in)
    b = jnp.zeros((fan_out,), jnp.float32)
    return w, b


def _ln_params(E):
    return jnp.ones((E,), jnp.float32), jnp.zeros((E,), jnp.float32)


def init_self_attn_params(key, E):
    ks = jax.random.split(key, 4)
    wq, bq = init_linear_params(ks[0], E, E)
    wk, bk = init_linear_params(ks[1], E, E)
    wv, bv = init_linear_params(ks[2], E, E)
    wo, bo = init_linear_params(ks[3], E, E)
    g, b = _ln_params(E)
    scale = 1.0 / math.sqrt(E // NHEAD)                 # fold 1/sqrt(Dh) into Q proj
    return dict(w_qkv=jnp.concatenate([wq * scale, wk, wv], axis=1).astype(jnp.bfloat16),
                b_qkv=jnp.concatenate([bq * scale, bk, bv]),
                w_o=wo.astype(jnp.bfloat16), b_o=bo, ln_g=g, ln_b=b)


def init_cross_attn_params(key, E):
    ks = jax.random.split(key, 4)
    wq, bq = init_linear_params(ks[0], E, E)
    wk, bk = init_linear_params(ks[1], E, E)
    wv, bv = init_linear_params(ks[2], E, E)
    wo, bo = init_linear_params(ks[3], E, E)
    g, b = _ln_params(E)
    scale = 1.0 / math.sqrt(E // NHEAD)                 # fold 1/sqrt(Dh) into Q proj
    return dict(w_q=(wq * scale).astype(jnp.bfloat16), b_q=bq * scale,
                w_kv=jnp.concatenate([wk, wv], axis=1).astype(jnp.bfloat16),
                b_kv=jnp.concatenate([bk, bv]),
                w_o=wo.astype(jnp.bfloat16), b_o=bo, ln_g=g, ln_b=b)


def init_ffn_params(key, E, F):
    k1, k2 = jax.random.split(key)
    w1, b1 = init_linear_params(k1, E, F)
    w2, b2 = init_linear_params(k2, F, E)
    g, b = _ln_params(E)
    return dict(w1=w1.astype(jnp.bfloat16), b1=b1,
                w2=w2.astype(jnp.bfloat16), b2=b2, ln_g=g, ln_b=b)


def init_encoder_layer_params(key, E, F):
    k1, k2 = jax.random.split(key)
    return dict(self_attn=init_self_attn_params(k1, E),
                ffn=init_ffn_params(k2, E, F))


def init_decoder_layer_params(key, E, F):
    k1, k2, k3 = jax.random.split(key, 3)
    return dict(self_attn=init_self_attn_params(k1, E),
                cross_attn=init_cross_attn_params(k2, E),
                ffn=init_ffn_params(k3, E, F))


def init_model_params(key, n_enc, n_dec, E, src_vocab, tgt_vocab, F, maxlen=64):
    ks = jax.random.split(key, n_enc + n_dec + 3)
    enc = [init_encoder_layer_params(ks[i], E, F) for i in range(n_enc)]
    dec = [init_decoder_layer_params(ks[n_enc + i], E, F) for i in range(n_dec)]
    src_emb = jax.random.normal(ks[-3], (src_vocab, E), jnp.float32)
    tgt_emb = jax.random.normal(ks[-2], (tgt_vocab, E), jnp.float32)
    gen_w, gen_b = init_linear_params(ks[-1], E, tgt_vocab)
    return dict(emb_size=E, enc_layers=enc, dec_layers=dec,
                src_emb=src_emb, tgt_emb=tgt_emb,
                gen_w=gen_w.astype(jnp.bfloat16), gen_b=gen_b,
                pos_embedding=make_pos_embedding(E, maxlen))


# --------------------------------------------------------------------------
# Demo
# --------------------------------------------------------------------------

if __name__ == "__main__":
    # E=128 keeps the linear / LN / generator / attention outputs lane-dense.
    EMB, FF = 128, 256
    SRC_VOCAB, TGT_VOCAB = 128, 256
    N_ENC, N_DEC = 2, 2
    S_SRC, S_TGT, B = 8, 8, 2

    root = jax.random.PRNGKey(0)
    pkey, dkey = jax.random.split(root)
    params = init_model_params(pkey, N_ENC, N_DEC, EMB, SRC_VOCAB, TGT_VOCAB, FF)

    k1, k2 = jax.random.split(dkey)
    src = jax.random.randint(k1, (S_SRC, B), 0, SRC_VOCAB, dtype=jnp.int32)
    trg = jax.random.randint(k2, (S_TGT, B), 0, TGT_VOCAB, dtype=jnp.int32)

    src_mask = jnp.zeros((S_SRC, S_SRC), jnp.float32)
    tgt_mask = jnp.where(jnp.triu(jnp.ones((S_TGT, S_TGT), bool), k=1),
                         NEG_INF, 0.0).astype(jnp.float32)          # causal mask
    src_padding_mask = jnp.zeros((B, S_SRC), bool).at[1, -2:].set(True)
    tgt_padding_mask = jnp.zeros((B, S_TGT), bool).at[1, -1:].set(True)
    memory_key_padding_mask = src_padding_mask

    # TODO(synk): dropout omitted (eval-mode identity); training-mode stochastic
    # dropout would use pltpu.prng_seed/prng_random_bits.
    out = seq2seq_forward(params, src, trg, src_mask, tgt_mask,
                          src_padding_mask, tgt_padding_mask,
                          memory_key_padding_mask)
    out = jax.block_until_ready(out)

    assert out.shape == (S_TGT, B, TGT_VOCAB), out.shape
    assert bool(jnp.all(jnp.isfinite(out)))
    print("KERNEL_OK")
</pallas_src>

<mosaic_0001>
module attributes {stable_mosaic.version = 11 : i64} {
  func.func @_embed_pe_kernel(%arg0: i32, %arg1: i32, %arg2: memref<1x8x128xf32, #tpu.memory_space<vmem>>, %arg3: memref<1x8x128xf32, #tpu.memory_space<vmem>>, %arg4: memref<1x8x128xbf16, #tpu.memory_space<vmem>>) attributes {dimension_semantics = [#tpu.dimension_semantics<parallel>, #tpu.dimension_semantics<parallel>], iteration_bounds = array<i64: 2, 1>, scalar_prefetch = 0 : i64, scratch_operands = 0 : i64, tpu.core_type = #tpu.core_type<tc>, window_params = [{transform_indices = @transform_0, window_bounds = array<i64: 1, 8, 128>}, {transform_indices = @transform_1, window_bounds = array<i64: 1, 8, 128>}, {transform_indices = @transform_2, window_bounds = array<i64: 1, 8, 128>}]} {
    %c0 = arith.constant 0 : index
    %c0_0 = arith.constant 0 : index
    %c0_1 = arith.constant 0 : index
    %0 = vector.load %arg2[%c0, %c0_0, %c0_1] : memref<1x8x128xf32, #tpu.memory_space<vmem>>, vector<1x8x128xf32>
    %cst = arith.constant 11.3137083 : f32
    %1 = vector.broadcast %cst : f32 to vector<1x8x128xf32>
    %2 = arith.mulf %0, %1 : vector<1x8x128xf32>
    %c0_2 = arith.constant 0 : index
    %c0_3 = arith.constant 0 : index
    %c0_4 = arith.constant 0 : index
    %3 = vector.load %arg3[%c0_2, %c0_3, %c0_4] : memref<1x8x128xf32, #tpu.memory_space<vmem>>, vector<1x8x128xf32>
    %4 = arith.addf %2, %3 : vector<1x8x128xf32>
    %5 = arith.truncf %4 : vector<1x8x128xf32> to vector<1x8x128xbf16>
    %c0_5 = arith.constant 0 : index
    %c0_6 = arith.constant 0 : index
    %c0_7 = arith.constant 0 : index
    %6 = vector.load %arg4[%c0_5, %c0_6, %c0_7] : memref<1x8x128xbf16, #tpu.memory_space<vmem>>, vector<1x8x128xbf16>
    tpu.vector_store %arg4[%c0_5, %c0_6, %c0_7], %5 {strides = array<i32>} : memref<1x8x128xbf16, #tpu.memory_space<vmem>>, vector<1x8x128xbf16>,
    return
  }
  func.func @transform_0(%arg0: i32, %arg1: i32) -> (i32, i32, i32) {
    %c0_i32 = arith.constant 0 : i32
    %c0_i32_0 = arith.constant 0 : i32
    return %arg0, %arg1, %c0_i32 : i32, i32, i32
  }
  func.func @transform_1(%arg0: i32, %arg1: i32) -> (i32, i32, i32) {
    %c0_i32 = arith.constant 0 : i32
    %c0_i32_0 = arith.constant 0 : i32
    %c0_i32_1 = arith.constant 0 : i32
    return %c0_i32, %arg1, %c0_i32_0 : i32, i32, i32
  }
  func.func @transform_2(%arg0: i32, %arg1: i32) -> (i32, i32, i32) {
    %c0_i32 = arith.constant 0 : i32
    %c0_i32_0 = arith.constant 0 : i32
    return %arg0, %arg1, %c0_i32 : i32, i32, i32
  }
}

</mosaic_0001>

<bundles_post_ra>
// kernel: tpu_custom_call.1
= control target key start
LH: loop header
LB: loop body
LE: loop exit
PB: predicated region body
PF: predicated region fallthrough
CT: control target
= control target key end

     0   :  { %7 = vsyncpa [#allocation3], 0  ;;  %s717_s0 = inlined_call_operand.hbm [shape: f32[2,8,128], index: 0, kind: input, shape index: {}]   ;;  %s718_s1 = inlined_call_operand.hbm [shape: f32[1,8,128], index: 1, kind: input, shape index: {}]   ;;  %s719_s2 = inlined_call_operand.hbm [shape: bf16[2,8,128], index: 2, kind: output, shape index: {}]  }
   0x1   :  { %9 = vsyncpa [#allocation3 + $0x1], 0 }
   0x2   :  { %10 = vsyncpa [#allocation6], 0 }
   0x3   :  { %11 = vsyncpa [#allocation4], 0 }
   0x4   :  { %13 = vsyncpa [#allocation4 + $0x1], 0  ;;  %s555_s9 = smov 0   ;;  %s557_s10 = smov 0  }
   0x5   :  { %s559_s11 = smov 0   ;;  %s561_s12 = smov 0  }
   0x6   :  { %s563_s13 = smov 0   ;;  %s565_s14 = smov 0  }
   0x7 LB: > { %s309_s15 = sadd.s32 4294967295, %s535_s14   ;;  %s310_s16 = sadd.s32 4294967294, %s535_s14   ;;  %s535_s14 = sphi %s565_s14, %s19_s14   ;;  %s531_s13 = sphi %s563_s13, %s736_s13   ;;  %s527_s12 = sphi %s561_s12, %s735_s12   ;;  %s523_s11 = sphi %s559_s11, %s734_s11   ;;  %s519_s10 = sphi %s557_s10, %s733_s10   ;;  %s515_s9 = sphi %s555_s9, %s732_s9  }
   0x8   : > { %p53_p0 = scmp.ne.s32.totalorder %s519_s10, %s515_s9  ;;  %p589_p1 = scmp.eq.s32.totalorder %s309_s15, 0 }
   0x9   : > { %p593_p2 = scmp.eq.s32.totalorder %s309_s15, 1  ;;  %p111_p3 = scmp.eq.s32.totalorder %s310_s16, 1 }
   0xa   : > { %p599_p4 = por %p589_p1, %p53_p0  ;;  %p311_p5 = scmp.ge.s32.totalorder %s535_s14, 1 }
   0xb   : > { %p604_p6 = por %p111_p3, %p53_p0  ;;  %p118_p7 = scmp.lt.s32.totalorder %s535_s14, 3 }
   0xc   : > { %s723_s19 = scalar_select %p599_p4, 1, 0 }
   0xd   : > { %s724_s20 = scalar_select %p604_p6, 1, 0 }
   0xe   : > { %p609_p8 = pnand %p311_p5, %p118_p7  ;;  %s537_s22 = smov [#allocation5]  }
   0xf   : > { %s133_s23 = sshll.u32 %s537_s22, 4  ;;  %s31_s25 = sadd.s32 1, %s531_s13  ;;  %s134_s23 = int_to_ptr.vmem [resolvable:$true] %s133_s23 }
  0x10   : > { %p332_p10 = pneg %p609_p8  ;;  %s40_s26 = sadd.s32 1, %s523_s11 }
  0x11   : > { %p33_p12 = scmp.ge.s32.totalorder %s31_s25, 2  ;;  %s408_s27 = scalar_lea.vmem %s134_s23, 128 }
  0x12   : > { %p618_p11 = pnand %p332_p10, %p589_p1  ;;  %p409_p0 = scmp.ne.s32.totalorder %s134_s23, %s408_s27 }
  0x13   : > { %p416_p7 = scmp.lt.s32.totalorder %s134_s23, %s134_s23  ;;  %p417_p6 = scmp.lt.s32.totalorder %s408_s27, %s408_s27 }
  0x14   : > { %p399_p13 = pneg %p618_p11 }
  0x15   : > { %p418_p9 = por %p417_p6, %p416_p7 }
  0x16   : > { %p411_p3 = pnand %p409_p0, %p399_p13 }
  0x18   : > { %p412_p5 = pneg %p411_p3 }
  0x1a   : > { %p419_p4 = pnand %p418_p9, %p412_p5 }
  0x1c   : > { %422 = shalt.err (!%p419_p4)
}
  0x1d   : > { %335 = dma.hbm_to_vmem [thread:$0]  (!%p618_p11), %s718_s1, 128, %s134_s23, [#allocation6]  }
  0x1e   : > { %s738_s25 = smov (%p33_p12, %s31_s25), 0  ;;  %p47_p6 = scmp.ne.s32.totalorder %s523_s11, %s519_s10 }
  0x1f   : > { %p48_p4 = scmp.eq.s32.totalorder %s535_s14, 0  ;;  %s35_s30 = ssub.s32 %s531_s13, %s738_s25 }
  0x20   : > { %p345_p9 = scmp.lt.s32.totalorder %s535_s14, 2  ;;  %p38_p10 = scmp.eq.s32.totalorder %s35_s30, 0 }
  0x21   : > { %p49_p13 = por %p48_p4, %p47_p6  ;;  %p641_p0 = por %p593_p2, %p47_p6 }
  0x22   : > { %s144_s4 = sand.u32 1, %s523_s11   ;;  %s315_s7 = sshll.u32 %s531_s13, 7 }
  0x23   : > { %s647_s5 = scalar_select %p38_p10, %s523_s11, %s40_s26  }
  0x24   : > { %s314_s6 = sshll.u32 %s144_s4, 3  ;;  %s154_s16 = scalar_lea.hbm %s717_s0, %s315_s7 }
  0x25   : > { %s148_s22 = scalar_lea.vmem [#allocation2], %s314_s6  ;;  %p653_p11 = pnand %p345_p9, %p49_p13 }
  0x26   : > { %s156_s23 = sshll.u32 %s148_s22, 4  ;;  %s145_s18 = scalar_lea.sflag [#allocation3], %s144_s4  ;;  %s157_s23 = int_to_ptr.vmem [resolvable:$true] %s156_s23 }
  0x27   : > { %p425_p2 = pneg %p653_p11  ;;  %s436_s27 = scalar_lea.vmem %s157_s23, 128 }
  0x28   : > { %p437_p12 = scmp.ne.s32.totalorder %s157_s23, %s436_s27  ;;  %s538_s26 = smov [#allocation2]  }
  0x29   : > { %s441_s28 = sshll.u32 %s538_s26, 4  ;;  %s442_s28 = int_to_ptr.vmem [resolvable:$false] %s441_s28 }
  0x2a   : > { %p439_p3 = pnand %p437_p12, %p425_p2  ;;  %s443_s29 = scalar_lea.vmem %s442_s28, 256 }
  0x2b   : > { %p444_p7 = scmp.lt.s32.totalorder %s157_s23, %s442_s28  ;;  %p445_p6 = scmp.lt.s32.totalorder %s443_s29, %s436_s27 }
  0x2c   : > { %p440_p5 = pneg %p439_p3 }
  0x2d   : > { %p446_p4 = por %p445_p6, %p444_p7 }
  0x2f   : > { %p447_p10 = pnand %p446_p4, %p440_p5 }
  0x31   : > { %450 = shalt.err (!%p447_p10)
}
  0x32   : > { %339 = dma.hbm_to_vmem [thread:$0]  (!%p653_p11), %s154_s16, 128, %s157_s23, %s145_s18  }
  0x33   : > { %165 = sbr.rel (%p609_p8) target bundleno = 83 (0x53), region = 28  ;;  %s664_s30 = sand.u32 (!%p609_p8), 1, %s519_s10  }
  0x34   : > { %s317_s4 = sshll.u32 (!%p609_p8), %s664_s30, 3  ;;  %s168_s6 = scalar_lea.sflag (!%p609_p8), [#allocation3], %s664_s30 }
  0x35   : > { %s171_s7 = scalar_lea.vmem (!%p609_p8), [#allocation2], %s317_s4  ;;  %p729_p9 = scmp.ne.s32.totalorder (!%p609_p8), %s723_s19, 0 }
  0x38   : > { %502 = dma.done.wait (%p729_p9), %s168_s6, 128  }
  0x39   : > { %504 = vsyncadd (%p729_p9), %s168_s6, 4294967168 }
  0x3a   : > { %506 = dma.done.wait (%p589_p1), [#allocation6], 128  }
  0x3b   : > { %508 = vsyncadd (%p589_p1), [#allocation6], 4294967168  ;;  %s319_s21 = sshll.u32 %s664_s30, 2  ;;  %v196_v0 = vld [vmem:[%s171_s7] sm:$0xff]  ;;  %v198_v1 = vld [vmem:[#allocation5] sm:$0xff]  ;;  %s321_s16 = sshll.u32 %s527_s12, 6 }
  0x3c   : > { %v197_v2 = vmul.f32 11.313708, %v196_v0  ;;  %s195_s8 = scalar_lea.vmem [#allocation7], %s319_s21  ;;  %s215_s23 = scalar_lea.hbm %s719_s2, %s321_s16 }
  0x3d   : > { %s217_s15 = sshll.u32 %s195_s8, 4  ;;  %s203_s17 = scalar_lea.sflag [#allocation4], %s664_s30  ;;  %s218_s15 = int_to_ptr.vmem [resolvable:$true] %s217_s15 }
  0x3e   : > { %v199_v3 = vadd.f32 %v198_v1, %v197_v2  ;;  %s451_s24 = scalar_lea.vmem %s218_s15, 64  ;;  %s539_s18 = smov [#allocation7]  }
  0x3f   : > { %p452_p1 = scmp.ne.s32.totalorder %s218_s15, %s451_s24  ;;  %s455_s27 = sshll.u32 %s539_s18, 4  ;;  %s456_s27 = int_to_ptr.vmem [resolvable:$false] %s455_s27 }
  0x40   : > { %v200_v4 = vpack.c.bf16 %v199_v3, %v199_v3  ;;  %s457_s26 = scalar_lea.vmem %s456_s27, 128  ;;  %p458_p11 = scmp.lt.s32.totalorder %s218_s15, %s456_s27 }
  0x41   : > { %p453_p8 = pnand %p452_p1, %p641_p0  ;;  %p459_p2 = scmp.lt.s32.totalorder %s457_s26, %s451_s24 }
  0x42   : > { %201 = vst [vmem:[%s195_s8] sm:$0xf] %v200_v4 }
  0x43   : > { %p454_p13 = pneg %p453_p8  ;;  %p460_p12 = por %p459_p2, %p458_p11 }
  0x45   : > { %p461_p3 = pnand %p460_p12, %p454_p13 }
  0x47   : > { %464 = shalt.err (!%p461_p3)
}
  0x48   : > { %s465_s12 = scalar_lea.hbm %s215_s23, 64  ;;  %s469_s30 = scalar_lea.hbm %s719_s2, 128 }
  0x49   : > { %p466_p5 = scmp.ne.s32.totalorder %s215_s23, %s465_s12  ;;  %p470_p4 = scmp.lt.s32.totalorder %s215_s23, %s719_s2 }
  0x4a   : > { %p471_p10 = scmp.lt.s32.totalorder %s469_s30, %s465_s12 }
  0x4b   : > { %p467_p7 = pnand %p466_p5, %p641_p0 }
  0x4c   : > { %p472_p9 = por %p471_p10, %p470_p4 }
  0x4d   : > { %p468_p6 = pneg %p467_p7 }
  0x4f   : > { %p473_p1 = pnand %p472_p9, %p468_p6 }
  0x51   : > { %476 = shalt.err (!%p473_p1)
}
  0x52   : > { %330 = dma.vmem_to_hbm [thread:$0]  (%p641_p0), %s218_s15, 64, %s215_s23, %s203_s17  }
  0x53 PF: > { %s229_s7 = sand.u32 1, %s515_s9   ;;  %p730_p8 = scmp.ne.s32.totalorder %s724_s20, 0 }
  0x54   : > { %p731_p13 = scmp.ge.s32.totalorder %s535_s14, 2  ;;  %s230_s21 = scalar_lea.sflag [#allocation4], %s229_s7 }
  0x56   : > { %p341_p11 = pnand %p731_p13, %p730_p8 }
  0x58   : > { %p342_p2 = pneg %p341_p11 }
  0x5a   : > { %510 = dma.done.wait (%p342_p2), %s230_s21, 64  }
  0x5b   : > { %512 = vsyncadd (%p342_p2), %s230_s21, 4294967232  ;;  %s19_s14 = sadd.s32 1, %s535_s14   ;;  %s732_s9 = smov %s519_s10 }
  0x5c   : > { %p16_p12 = scmp.ge.s32.totalorder %s19_s14, 4   ;;  %s733_s10 = smov %s523_s11 }
  0x5d   : > { %s734_s11 = smov %s647_s5  ;;  %s735_s12 = smov %s531_s13 }
  0x5e   : > { %s736_s13 = smov %s738_s25  ;;  %18 = sbr.rel (!%p16_p12) target bundleno = 7 (0x7), region = 78 }
  0x63   :  { %235 = vsyncpa [#allocation3], 1 }
  0x64   :  { %237 = vsyncpa [#allocation3 + $0x1], 1 }
  0x65   :  { %238 = vsyncpa [#allocation6], 1 }
  0x66   :  { %239 = vsyncpa [#allocation4], 1 }
  0x67   :  { %241 = vsyncpa [#allocation4 + $0x1], 1 }

</bundles_post_ra>
